<compile_context>
chip_gen: v7x
topology: tpu7x:2x2x1
jax: 0.10.0
libtpu: 0.0.40
codegen_flags: <defaults>
</compile_context>

<pallas_src>
import functools

import jax
import jax.numpy as jnp
import numpy as np
from jax import lax
from jax.experimental import pallas as pl
from jax.experimental.pallas import tpu as pltpu


def _round_up(n, m):
    return ((n + m - 1) // m) * m


def _pick_act_dtype():
    """bf16 activations on chips with a bf16 EUP (v6e/v7x); f32 otherwise (v5e & older)."""
    try:
        kind = jax.devices()[0].device_kind.lower()
    except Exception:
        return jnp.float32
    for old in ("v2", "v3", "v4", "v5"):
        if old in kind:
            return jnp.float32
    return jnp.bfloat16


def encoder_kernel(x_ref, w0_ref, b0_ref, w1_ref, b1_ref, w2_ref, b2_ref, o_ref,
                   *, act_dtype):
    """Fused 3-layer MLP, transposed (lane-dense) compute layout.

    x_ref : (Bt, seq_len) f32   (as stored in HBM; batch on sublanes here)
    wK    : (out_K, in_K) bf16  (PyTorch weight layout)
    bK    : (out_K, 1)    f32
    o_ref : (emb, Bt)     f32   (batch on lanes -> dense stores)
    """
    # bf16 cast + layout change happen in-kernel: no extra HBM passes over x.
    x = x_ref[...].astype(jnp.bfloat16)                       # (Bt, S)

    def sigmoid1(h):
        # Single-EUP-op sigmoid: 0.5 * tanh(0.5*h) + 0.5
        h = h.astype(act_dtype)
        return jnp.tanh(h * 0.5) * 0.5 + 0.5

    # Layer 0: h^T = W0 @ x^T  (contract both operands' last dim; Mosaic handles
    # the operand transpose on the MXU, no explicit XLU transpose needed).
    h = lax.dot_general(w0_ref[...], x, (((1,), (1,)), ((), ())),
                        preferred_element_type=jnp.float32) + b0_ref[...]
    h = sigmoid1(h).astype(jnp.bfloat16)                      # (h0, Bt)

    # Layer 1
    h = jnp.dot(w1_ref[...], h, preferred_element_type=jnp.float32) + b1_ref[...]
    h = sigmoid1(h).astype(jnp.bfloat16)                      # (h1, Bt)

    # Layer 2 + Tanh
    h = jnp.dot(w2_ref[...], h, preferred_element_type=jnp.float32) + b2_ref[...]
    o_ref[...] = jnp.tanh(h.astype(act_dtype)).astype(o_ref.dtype)   # (emb, Bt)


def encoder_forward(x, params, *, block_b=8192, act_dtype=None):
    """x: (B, seq_len, 1) float32  ->  (B, embedding_dim, 1) float32."""
    if act_dtype is None:
        act_dtype = _pick_act_dtype()

    x2 = jnp.squeeze(x, -1)                       # (B, seq_len); metadata-only reshape
    B, seq_len = x2.shape
    h0 = params["w0"].shape[0]                    # (out, in)
    h1 = params["w1"].shape[0]
    emb = params["w2"].shape[0]

    # ---- batch tiling (batch sits on the 128-lane axis inside the kernel) ----
    block_b = max(128, _round_up(block_b, 128))
    Bp = _round_up(B, 128)
    if Bp <= block_b:
        Bt = Bp
    else:
        n = pl.cdiv(Bp, block_b)
        n += n % 2                                # even tile count: both v7x TCs busy
        Bt = _round_up(pl.cdiv(Bp, n), 128)
    n_tiles = pl.cdiv(B, Bt)
    Bpad = n_tiles * Bt                           # padded output -> all stores dense

    # Tiny one-time weight casts; weights stay VMEM-resident via constant index maps.
    w0 = params["w0"].astype(jnp.bfloat16)
    w1 = params["w1"].astype(jnp.bfloat16)
    w2 = params["w2"].astype(jnp.bfloat16)
    b0, b1, b2 = params["b0"], params["b1"], params["b2"]     # (out, 1) f32

    const = lambda i: (0, 0)
    out_t = pl.pallas_call(
        functools.partial(encoder_kernel, act_dtype=act_dtype),
        out_shape=jax.ShapeDtypeStruct((emb, Bpad), jnp.float32),
        grid=(n_tiles,),
        in_specs=[
            pl.BlockSpec((Bt, seq_len), lambda i: (i, 0)),    # x tile; ragged tail masked
            pl.BlockSpec((h0, seq_len), const),
            pl.BlockSpec((h0, 1), const),
            pl.BlockSpec((h1, h0), const),
            pl.BlockSpec((h1, 1), const),
            pl.BlockSpec((emb, h1), const),
            pl.BlockSpec((emb, 1), const),
        ],
        out_specs=pl.BlockSpec((emb, Bt), lambda i: (0, i)),
        compiler_params=pltpu.CompilerParams(
            dimension_semantics=("parallel",)),
    )(x2, w0, b0, w1, b1, w2, b2)

    # Output is tiny (emb rows); downstream could consume the (emb, B) layout
    # directly to drop this pass entirely.
    out = jnp.transpose(out_t[:, :B])             # (B, emb)
    return out[..., None]                         # unsqueeze(-1)


def init_params(key, seq_len, hidden_dims, embedding_dim):
    """Deterministic init mimicking nn.Linear's uniform(-1/sqrt(fan_in), 1/sqrt(fan_in)).

    Weights stored in PyTorch (out_features, in_features) layout; biases (out, 1).
    """
    dims = [seq_len] + list(hidden_dims) + [embedding_dim]
    params = {}
    for i in range(len(dims) - 1):
        fan_in, fan_out = dims[i], dims[i + 1]
        key, kw, kb = jax.random.split(key, 3)
        bound = 1.0 / np.sqrt(fan_in)
        params[f"w{i}"] = jax.random.uniform(kw, (fan_out, fan_in), jnp.float32, -bound, bound)
        params[f"b{i}"] = jax.random.uniform(kb, (fan_out, 1), jnp.float32, -bound, bound)
    return params


def encoder_reference(x, params):
    """Pure-JAX f32 reference of the same forward pass."""
    h = jnp.squeeze(x, -1)
    h = jax.nn.sigmoid(h @ params["w0"].T + params["b0"][:, 0])
    h = jax.nn.sigmoid(h @ params["w1"].T + params["b1"][:, 0])
    h = jnp.tanh(h @ params["w2"].T + params["b2"][:, 0])
    return h[..., None]


if __name__ == "__main__":
    # config: seq_len=16, hidden_dim=[32, 32], embedding_dim=8, mode='aleatoric'
    seq_len, hidden_dims, embedding_dim = 16, (32, 32), 8

    key = jax.random.PRNGKey(0)
    key, kx = jax.random.split(key)
    params = init_params(key, seq_len, hidden_dims, embedding_dim)

    # Case 1: tiny batch (matches original toy usage); single 128-lane tile,
    # ragged columns handled by block masking (no wrapper pad/transpose/cast).
    batch = 8
    x = jax.random.normal(kx, (batch, seq_len, 1), jnp.float32)
    out = jax.block_until_ready(encoder_forward(x, params))
    ref = encoder_reference(x, params)
    assert out.shape == (batch, embedding_dim, 1), out.shape
    # bf16 matmul operands (+ bf16 activations on v6e/v7x) -> relaxed tolerance.
    np.testing.assert_allclose(np.asarray(out), np.asarray(ref), rtol=3e-2, atol=3e-2)

    # Case 2: larger, ragged batch to exercise multiple grid steps + masked tail.
    key, kx2 = jax.random.split(key)
    batch2 = 300
    x2 = jax.random.normal(kx2, (batch2, seq_len, 1), jnp.float32)
    out2 = jax.block_until_ready(encoder_forward(x2, params, block_b=256))
    ref2 = encoder_reference(x2, params)
    assert out2.shape == (batch2, embedding_dim, 1), out2.shape
    np.testing.assert_allclose(np.asarray(out2), np.asarray(ref2), rtol=3e-2, atol=3e-2)

    print("KERNEL_OK")
</pallas_src>

<mosaic_0001>
module attributes {stable_mosaic.version = 11 : i64} {
  func.func @encoder_kernel(%arg0: i32, %arg1: memref<128x16xf32, #tpu.memory_space<vmem>>, %arg2: memref<32x16xbf16, #tpu.memory_space<vmem>>, %arg3: memref<32x1xf32, #tpu.memory_space<vmem>>, %arg4: memref<32x32xbf16, #tpu.memory_space<vmem>>, %arg5: memref<32x1xf32, #tpu.memory_space<vmem>>, %arg6: memref<8x32xbf16, #tpu.memory_space<vmem>>, %arg7: memref<8x1xf32, #tpu.memory_space<vmem>>, %arg8: memref<8x128xf32, #tpu.memory_space<vmem>>) attributes {dimension_semantics = [#tpu.dimension_semantics<parallel>], iteration_bounds = array<i64: 1>, scalar_prefetch = 0 : i64, scratch_operands = 0 : i64, tpu.core_type = #tpu.core_type<tc>, window_params = [{transform_indices = @transform_0, window_bounds = array<i64: 128, 16>}, {pipeline_mode = #tpu.pipeline_mode<synchronous>, transform_indices = @transform_1, window_bounds = array<i64: 32, 16>}, {pipeline_mode = #tpu.pipeline_mode<synchronous>, transform_indices = @transform_2, window_bounds = array<i64: 32, 1>}, {pipeline_mode = #tpu.pipeline_mode<synchronous>, transform_indices = @transform_3, window_bounds = array<i64: 32, 32>}, {pipeline_mode = #tpu.pipeline_mode<synchronous>, transform_indices = @transform_4, window_bounds = array<i64: 32, 1>}, {pipeline_mode = #tpu.pipeline_mode<synchronous>, transform_indices = @transform_5, window_bounds = array<i64: 8, 32>}, {pipeline_mode = #tpu.pipeline_mode<synchronous>, transform_indices = @transform_6, window_bounds = array<i64: 8, 1>}, {transform_indices = @transform_7, window_bounds = array<i64: 8, 128>}]} {
    %c0 = arith.constant 0 : index
    %c0_0 = arith.constant 0 : index
    %0 = vector.load %arg1[%c0, %c0_0] : memref<128x16xf32, #tpu.memory_space<vmem>>, vector<128x16xf32>
    %1 = arith.truncf %0 : vector<128x16xf32> to vector<128x16xbf16>
    %c0_1 = arith.constant 0 : index
    %c0_2 = arith.constant 0 : index
    %2 = vector.load %arg2[%c0_1, %c0_2] : memref<32x16xbf16, #tpu.memory_space<vmem>>, vector<32x16xbf16>
    %cst = arith.constant dense<0.000000e+00> : vector<32x128xf32>
    %3 = tpu.matmul %2, %1, %cst {dimension_numbers = #tpu.dot_dimension_numbers<[1], [1], [0], [0], [0, 0, 1, 0], [], []>} : vector<32x16xbf16>, vector<128x16xbf16>, vector<32x128xf32> -> vector<32x128xf32>
    %c0_3 = arith.constant 0 : index
    %c0_4 = arith.constant 0 : index
    %4 = vector.load %arg3[%c0_3, %c0_4] : memref<32x1xf32, #tpu.memory_space<vmem>>, vector<32x1xf32>
    %5 = vector.broadcast %4 : vector<32x1xf32> to vector<32x128xf32>
    %6 = arith.addf %3, %5 : vector<32x128xf32>
    %7 = arith.truncf %6 : vector<32x128xf32> to vector<32x128xbf16>
    %cst_5 = arith.constant 5.000000e-01 : bf16
    %8 = vector.broadcast %cst_5 : bf16 to vector<32x128xbf16>
    %9 = arith.mulf %7, %8 : vector<32x128xbf16>
    %10 = math.tanh %9 : vector<32x128xbf16>
    %cst_6 = arith.constant 5.000000e-01 : bf16
    %11 = vector.broadcast %cst_6 : bf16 to vector<32x128xbf16>
    %12 = arith.mulf %10, %11 : vector<32x128xbf16>
    %cst_7 = arith.constant 5.000000e-01 : bf16
    %13 = vector.broadcast %cst_7 : bf16 to vector<32x128xbf16>
    %14 = arith.addf %12, %13 : vector<32x128xbf16>
    %c0_8 = arith.constant 0 : index
    %c0_9 = arith.constant 0 : index
    %15 = vector.load %arg4[%c0_8, %c0_9] : memref<32x32xbf16, #tpu.memory_space<vmem>>, vector<32x32xbf16>
    %cst_10 = arith.constant dense<0.000000e+00> : vector<32x128xf32>
    %16 = tpu.matmul %15, %14, %cst_10 {dimension_numbers = #tpu.dot_dimension_numbers<[1], [0], [0], [1], [0, 0, 1, 1], [], []>} : vector<32x32xbf16>, vector<32x128xbf16>, vector<32x128xf32> -> vector<32x128xf32>
    %c0_11 = arith.constant 0 : index
    %c0_12 = arith.constant 0 : index
    %17 = vector.load %arg5[%c0_11, %c0_12] : memref<32x1xf32, #tpu.memory_space<vmem>>, vector<32x1xf32>
    %18 = vector.broadcast %17 : vector<32x1xf32> to vector<32x128xf32>
    %19 = arith.addf %16, %18 : vector<32x128xf32>
    %20 = arith.truncf %19 : vector<32x128xf32> to vector<32x128xbf16>
    %cst_13 = arith.constant 5.000000e-01 : bf16
    %21 = vector.broadcast %cst_13 : bf16 to vector<32x128xbf16>
    %22 = arith.mulf %20, %21 : vector<32x128xbf16>
    %23 = math.tanh %22 : vector<32x128xbf16>
    %cst_14 = arith.constant 5.000000e-01 : bf16
    %24 = vector.broadcast %cst_14 : bf16 to vector<32x128xbf16>
    %25 = arith.mulf %23, %24 : vector<32x128xbf16>
    %cst_15 = arith.constant 5.000000e-01 : bf16
    %26 = vector.broadcast %cst_15 : bf16 to vector<32x128xbf16>
    %27 = arith.addf %25, %26 : vector<32x128xbf16>
    %c0_16 = arith.constant 0 : index
    %c0_17 = arith.constant 0 : index
    %28 = vector.load %arg6[%c0_16, %c0_17] : memref<8x32xbf16, #tpu.memory_space<vmem>>, vector<8x32xbf16>
    %cst_18 = arith.constant dense<0.000000e+00> : vector<8x128xf32>
    %29 = tpu.matmul %28, %27, %cst_18 {dimension_numbers = #tpu.dot_dimension_numbers<[1], [0], [0], [1], [0, 0, 1, 1], [], []>} : vector<8x32xbf16>, vector<32x128xbf16>, vector<8x128xf32> -> vector<8x128xf32>
    %c0_19 = arith.constant 0 : index
    %c0_20 = arith.constant 0 : index
    %30 = vector.load %arg7[%c0_19, %c0_20] : memref<8x1xf32, #tpu.memory_space<vmem>>, vector<8x1xf32>
    %31 = vector.broadcast %30 : vector<8x1xf32> to vector<8x128xf32>
    %32 = arith.addf %29, %31 : vector<8x128xf32>
    %33 = arith.truncf %32 : vector<8x128xf32> to vector<8x128xbf16>
    %34 = math.tanh %33 : vector<8x128xbf16>
    %35 = arith.extf %34 : vector<8x128xbf16> to vector<8x128xf32>
    %c0_21 = arith.constant 0 : index
    %c0_22 = arith.constant 0 : index
    %36 = vector.load %arg8[%c0_21, %c0_22] : memref<8x128xf32, #tpu.memory_space<vmem>>, vector<8x128xf32>
    tpu.vector_store %arg8[%c0_21, %c0_22], %35 {strides = array<i32>} : memref<8x128xf32, #tpu.memory_space<vmem>>, vector<8x128xf32>,
    return
  }
  func.func @transform_0(%arg0: i32) -> (i32, i32) {
    %c0_i32 = arith.constant 0 : i32
    %c0_i32_0 = arith.constant 0 : i32
    return %arg0, %c0_i32 : i32, i32
  }
  func.func @transform_1(%arg0: i32) -> (i32, i32) {
    %c0_i32 = arith.constant 0 : i32
    %c0_i32_0 = arith.constant 0 : i32
    %c0_i32_1 = arith.constant 0 : i32
    return %c0_i32, %c0_i32_0 : i32, i32
  }
  func.func @transform_2(%arg0: i32) -> (i32, i32) {
    %c0_i32 = arith.constant 0 : i32
    %c0_i32_0 = arith.constant 0 : i32
    %c0_i32_1 = arith.constant 0 : i32
    return %c0_i32, %c0_i32_0 : i32, i32
  }
  func.func @transform_3(%arg0: i32) -> (i32, i32) {
    %c0_i32 = arith.constant 0 : i32
    %c0_i32_0 = arith.constant 0 : i32
    %c0_i32_1 = arith.constant 0 : i32
    return %c0_i32, %c0_i32_0 : i32, i32
  }
  func.func @transform_4(%arg0: i32) -> (i32, i32) {
    %c0_i32 = arith.constant 0 : i32
    %c0_i32_0 = arith.constant 0 : i32
    %c0_i32_1 = arith.constant 0 : i32
    return %c0_i32, %c0_i32_0 : i32, i32
  }
  func.func @transform_5(%arg0: i32) -> (i32, i32) {
    %c0_i32 = arith.constant 0 : i32
    %c0_i32_0 = arith.constant 0 : i32
    %c0_i32_1 = arith.constant 0 : i32
    return %c0_i32, %c0_i32_0 : i32, i32
  }
  func.func @transform_6(%arg0: i32) -> (i32, i32) {
    %c0_i32 = arith.constant 0 : i32
    %c0_i32_0 = arith.constant 0 : i32
    %c0_i32_1 = arith.constant 0 : i32
    return %c0_i32, %c0_i32_0 : i32, i32
  }
  func.func @transform_7(%arg0: i32) -> (i32, i32) {
    %c0_i32 = arith.constant 0 : i32
    %c0_i32_0 = arith.constant 0 : i32
    return %c0_i32, %arg0 : i32, i32
  }
}

</mosaic_0001>

<bundles_post_ra>
// kernel: tpu_custom_call.1
= control target key start
LH: loop header
LB: loop body
LE: loop exit
PB: predicated region body
PF: predicated region fallthrough
CT: control target
= control target key end

     0   :  { %vm91_vm0 = vcmask 130048   ;;  %v467_v5 = vmov 0   ;;  %s634_s0 = inlined_call_operand.vmem [shape: f32[8,16], index: 0, kind: input, shape index: {}]   ;;  %s635_s1 = inlined_call_operand.vmem [shape: bf16[32,16], index: 1, kind: input, shape index: {}]   ;;  %s636_s2 = inlined_call_operand.vmem [shape: f32[32,1], index: 2, kind: input, shape index: {}]   ;;  %s637_s3 = inlined_call_operand.vmem [shape: bf16[32,32], index: 3, kind: input, shape index: {}]   ;;  %s638_s4 = inlined_call_operand.vmem [shape: f32[32,1], index: 4, kind: input, shape index: {}]   ;;  %s639_s5 = inlined_call_operand.vmem [shape: bf16[8,32], index: 5, kind: input, shape index: {}]   ;;  %s640_s6 = inlined_call_operand.vmem [shape: f32[8,1], index: 6, kind: input, shape index: {}]   ;;  %s641_s7 = inlined_call_operand.hbm [shape: f32[8,128], index: 7, kind: output, shape index: {}]  }
   0x1   :  { %v29_v0 = vld [vmem:[%s634_s0] sm:$0xff]  ;;  %v30_v1 = vld [vmem:[%s634_s0 + $0x8] sm:$0xff]  ;;  %v31_v2 = vld [vmem:[%s634_s0 + $0x10] sm:$0xff]  ;;  %427 = vset.pattern.permute.xlu0 %v467_v5  ;;  %428 = vset.pattern.permute.xlu1 %v467_v5 }
   0x2   :  { %v45_v3 = vpack.c.bf16 %v30_v1, %v29_v0  ;;  %v32_v4 = vld [vmem:[%s634_s0 + $0x18] sm:$0xff]  ;;  %v33_v8 = vld [vmem:[%s634_s0 + $0x20] sm:$0xff]  ;;  %v34_v9 = vld [vmem:[%s634_s0 + $0x28] sm:$0xff] }
   0x3   :  { %v46_v6 = vpack.c.bf16 %v32_v4, %v31_v2  ;;  %v429_v10 = vld [vmem:[%s635_s1] sm:$0xff]   ;;  %v59_v12 = vld [vmem:[%s636_s2 + $0x10] sm:$0xff]  ;;  %v47_v14 = vpack.c.bf16 %v34_v9, %v33_v8  ;;  %v58_v15 = vld [vmem:[%s636_s2 + $0x8] sm:$0xff] }
   0x4   :  { %415 = vmatprep.subr.msk.bf16.mxu0 %vm91_vm0, %v45_v3  ;;  %v99_v7 = vsel %vm91_vm0, %v45_v3, 0  ;;  %v57_v11 = vld [vmem:[%s636_s2] sm:$0xff]  ;;  %395 = vmatprep.mubr.msk.bf16.mxu0 %vm91_vm0, %v429_v10  ;;  %v60_v16 = vld [vmem:[%s636_s2 + $0x18] sm:$0xff] }
   0x5   :  { %380 = vmatpush3.bf16.xpose.msra.mxu0 %v99_v7  ;;  %63 = vperm.xlu0 %427, %v57_v11   ;;  %v102_v13 = vsel %vm91_vm0, %v46_v6, 0 }
   0x6   :  { %416 = vmatprep.subr.msk.bf16.mxu0 %vm91_vm0, %v46_v6  ;;  %73 = vperm.xlu1 %428, %v59_v12  }
   0x7   :  { %12 = vsyncpa [#allocation3], 0  ;;  %v185_v17 = vld [vmem:[%s638_s4] sm:$0xff]  ;;  %v35_v18 = vld [vmem:[%s634_s0 + $0x30] sm:$0xff]  ;;  %v105_v21 = vsel %vm91_vm0, %v47_v14, 0  ;;  %vm219_vm1 = vcmask 261120  }
   0x8   :  { %v36_v19 = vld [vmem:[%s634_s0 + $0x38] sm:$0xff]  ;;  %v186_v20 = vld [vmem:[%s638_s4 + $0x8] sm:$0xff]  ;;  %v187_v23 = vld [vmem:[%s638_s4 + $0x10] sm:$0xff]  ;;  %v468_v4 = vmov 0.0   ;;  %vm469_vm2 = vmmov 0   ;;  %s470_s8 = smov [#allocation2]  }
   0x9   :  { %68 = vperm.xlu0 %427, %v58_v15   ;;  %v48_v22 = vpack.c.bf16 %v36_v19, %v35_v18  ;;  %v188_v24 = vld [vmem:[%s638_s4 + $0x18] sm:$0xff]  ;;  %v286_v25 = vld [vmem:[%s640_s6] sm:$0xff]  ;;  %v38_v27 = vld [vmem:[%s634_s0 + $0x48] sm:$0xff]  ;;  %s345_s9 = sshll.u32 %s470_s8, 4  ;;  %s346_s9 = int_to_ptr.vmem [resolvable:$true] %s345_s9 }
   0xa   :  { %78 = vperm.xlu1 %428, %v60_v16   ;;  %v37_v26 = vld [vmem:[%s634_s0 + $0x40] sm:$0xff]  ;;  %v39_v30 = vld [vmem:[%s634_s0 + $0x50] sm:$0xff]  ;;  %v40_v31 = vld [vmem:[%s634_s0 + $0x58] sm:$0xff]  ;;  %s443_s10 = scalar_lea.vmem %s346_s9, 128  ;;  %p448_p1 = scmp.lt.s32.totalorder %s346_s9, %s346_s9 }
   0xb   :  { %v108_v28 = vsel %vm91_vm0, %v48_v22, 0  ;;  %v49_v29 = vpack.c.bf16 %v38_v27, %v37_v26  ;;  %v50_v33 = vpack.c.bf16 %v40_v31, %v39_v30  ;;  %v41_v34 = vld [vmem:[%s634_s0 + $0x60] sm:$0xff]  ;;  %v42_v35 = vld [vmem:[%s634_s0 + $0x68] sm:$0xff]  ;;  %v43_v38 = vld [vmem:[%s634_s0 + $0x70] sm:$0xff]  ;;  %p444_p0 = scmp.ne.s32.totalorder %s346_s9, %s443_s10  ;;  %p449_p2 = scmp.lt.s32.totalorder %s443_s10, %s443_s10 }
   0xc   :  { %v51_v37 = vpack.c.bf16 %v42_v35, %v41_v34  ;;  %v44_v39 = vld [vmem:[%s634_s0 + $0x78] sm:$0xff]  ;;  %v430_v43 = vld [vmem:[%s635_s1 + $0x8] sm:$0xff]   ;;  %v431_v44 = vld [vmem:[%s637_s3] sm:$0xff]  }
   0xd   :  { %382 = vmatpush3.bf16.xpose.msra.mxu0 %v102_v13  ;;  %191 = vperm.xlu0 %427, %v185_v17   ;;  %v111_v32 = vsel %vm91_vm0, %v49_v29, 0  ;;  %v114_v36 = vsel %vm91_vm0, %v50_v33, 0  ;;  %v52_v41 = vpack.c.bf16 %v44_v39, %v43_v38  ;;  %v432_v3 = vld [vmem:[%s637_s3 + $0x8] sm:$0xff]   ;;  %v285_v27 = vld [vmem:[%s639_s5] sm:$0xf]  ;;  %p450_p3 = por %p449_p2, %p448_p1 }
   0xe   :  { %417 = vmatprep.subr.msk.bf16.mxu0 %vm91_vm0, %v47_v14  ;;  %196 = vperm.xlu1 %428, %v186_v20   ;;  %v117_v40 = vsel %vm91_vm0, %v51_v37, 0 }
   0xf   :  { %v120_v42 = vsel %vm91_vm0, %v52_v41, 0  ;;  %403 = vmatprep.mubr.msk.bf16.mxu1 %vm219_vm1, %v431_v44  ;;  %p451_p4 = pnand %p450_p3, %p444_p0 }
  0x11   :  { %201 = vperm.xlu0 %427, %v187_v23  }
  0x12   :  { %206 = vperm.xlu1 %428, %v188_v24  }
  0x15   :  { %384 = vmatpush3.bf16.xpose.msra.mxu0 %v105_v21  ;;  %289 = vperm.xlu0 %427, %v286_v25  }
  0x16   :  { %418 = vmatprep.subr.msk.bf16.mxu0 %vm91_vm0, %v48_v22 }
  0x1d   :  { %386 = vmatpush3.bf16.xpose.msra.mxu0 %v108_v28 }
  0x1e   :  { %419 = vmatprep.subr.msk.bf16.mxu0 %vm91_vm0, %v49_v29 }
  0x25   :  { %388 = vmatpush3.bf16.xpose.msra.mxu0 %v111_v32 }
  0x26   :  { %420 = vmatprep.subr.msk.bf16.mxu0 %vm91_vm0, %v50_v33 }
  0x2d   :  { %390 = vmatpush3.bf16.xpose.msra.mxu0 %v114_v36 }
  0x2e   :  { %421 = vmatprep.subr.msk.bf16.mxu0 %vm91_vm0, %v51_v37 }
  0x35   :  { %392 = vmatpush3.bf16.xpose.msra.mxu0 %v117_v40 }
  0x36   :  { %422 = vmatprep.subr.msk.bf16.mxu0 %vm91_vm0, %v52_v41 }
  0x3d   :  { %394 = vmatpush3.bf16.xpose.msra.mxu0 %v120_v42 }
  0x44   :  { %396 = vmatmul.mubr.msk.bf16.vlgmr.msra.gmra.mrb[0].mxu0 %vm91_vm0, %v430_v43 }
  0x84   :  { %v64_v46 = vpop.permute.xlu0 %63 }
  0x85   :  { %v74_v45 = vpop.permute.xlu1 %73 }
  0x88   :  { %v69_v51 = vpop.permute.xlu0 %68 }
  0x89   :  { %v79_v49 = vpop.permute.xlu1 %78 }
  0x8c   :  { %v192_v5 = vpop.permute.xlu0 %191 }
  0x8d   :  { %v197_v6 = vpop.permute.xlu1 %196 }
  0x90   :  { %v202_v8 = vpop.permute.xlu0 %201 }
  0x91   :  { %v207_v10 = vpop.permute.xlu1 %206 }
  0x94   :  { %v290_v28 = vpop.permute.xlu0 %289 }
 0x117   :  { %v397_v47 = vpop.f32.mrb[0].mxu0 }
 0x118   :  { %v156_v48 = vpop.f32.mrb[1].mxu0  ;;  %v165_v52 = vadd.f32 %v397_v47, %v74_v45 }
 0x119   :  { %v398_v50 = vpop.f32.mrb[2].mxu0  ;;  %v157_v55 = vadd.f32 %v156_v48, %v64_v46 }
 0x11a   :  { %v168_v53 = vadd.f32 %v398_v50, %v79_v49  ;;  %v159_v54 = vpop.f32.mrb[3].mxu0 }
 0x11b   :  { %v160_v56 = vadd.f32 %v159_v54, %v69_v51 }
 0x11c   :  { %v172_v57 = vpack.c.bf16 %v168_v53, %v165_v52 }
 0x11d   :  { %v171_v58 = vpack.c.bf16 %v160_v56, %v157_v55 }
 0x11e   :  { %v174_v59 = vmul.bf16 1056980736, %v172_v57 }
 0x11f   :  { %v173_v60 = vmul.bf16 1056980736, %v171_v58 }
 0x120   :  { %433 = vtanh.bf16 %v174_v59 }
 0x121   :  { %435 = vtanh.bf16 %v173_v60 }
 0x12b   :  { %v434_v61 = vpop.eup %433 }
 0x12c   :  { %v436_v62 = vpop.eup %435  ;;  %v178_v0 = vmul.bf16 1056980736, %v434_v61 }
 0x12d   :  { %v177_v63 = vmul.bf16 1056980736, %v436_v62 }
 0x12e   :  { %v180_v2 = vadd.bf16 1056980736, %v178_v0 }
 0x12f   :  { %v179_v1 = vadd.bf16 1056980736, %v177_v63 }
 0x131   :  { %399 = vmatprep.subr.bf16.mxu1 %v179_v1 }
 0x132   :  { %400 = vmatpush3.bf16.msra.mxu1 %v179_v1 }
 0x133   :  { %401 = vmatprep.subr.bf16.mxu1 %v180_v2 }
 0x136   :  { %402 = vmatpush3.bf16.msra.mxu1 %v180_v2 }
 0x137   :  { %407 = vmatprep.subr.bf16.mxu1 %v468_v4 }
 0x139   :  { %404 = vmatmul.mubr.msk.bf16.vlgmr.msra.gmra.mrb[0].mxu1 %vm219_vm1, %v432_v3 }
 0x13a   :  { %411 = vmatprep.mubr.msk.bf16.mxu1 %vm469_vm2, %v468_v4 }
 0x20c   :  { %v405_v7 = vpop.f32.mrb[0].mxu1 }
 0x20d   :  { %v260_v9 = vpop.f32.mrb[1].mxu1  ;;  %v269_v12 = vadd.f32 %v405_v7, %v202_v8 }
 0x20e   :  { %v406_v11 = vpop.f32.mrb[2].mxu1  ;;  %v261_v15 = vadd.f32 %v260_v9, %v192_v5 }
 0x20f   :  { %v272_v13 = vadd.f32 %v406_v11, %v207_v10  ;;  %v263_v14 = vpop.f32.mrb[3].mxu1 }
 0x210   :  { %v264_v16 = vadd.f32 %v263_v14, %v197_v6 }
 0x211   :  { %v276_v17 = vpack.c.bf16 %v272_v13, %v269_v12 }
 0x212   :  { %v275_v18 = vpack.c.bf16 %v264_v16, %v261_v15 }
 0x213   :  { %v278_v19 = vmul.bf16 1056980736, %v276_v17 }
 0x214   :  { %v277_v20 = vmul.bf16 1056980736, %v275_v18 }
 0x215   :  { %437 = vtanh.bf16 %v278_v19 }
 0x216   :  { %439 = vtanh.bf16 %v277_v20 }
 0x220   :  { %v438_v21 = vpop.eup %437 }
 0x221   :  { %v440_v22 = vpop.eup %439  ;;  %v282_v24 = vmul.bf16 1056980736, %v438_v21 }
 0x222   :  { %v281_v23 = vmul.bf16 1056980736, %v440_v22 }
 0x223   :  { %v284_v26 = vadd.bf16 1056980736, %v282_v24 }
 0x224   :  { %v283_v25 = vadd.bf16 1056980736, %v281_v23 }
 0x226   :  { %408 = vmatpush3.bf16.msra.mxu1 %v283_v25 }
 0x227   :  { %409 = vmatprep.subr.bf16.mxu1 %v468_v4 }
 0x22a   :  { %410 = vmatpush3.bf16.msra.mxu1 %v284_v26 }
 0x22d   :  { %412 = vmatmul.mubr.msk.bf16.vlgmr.msra.gmra.mrb[4].mxu1 %vm219_vm1, %v285_v27 }
 0x300   :  { %v329_v29 = vpop.f32.mrb[4].mxu1 }
 0x301   :  { %v330_v30 = vadd.f32 %v329_v29, %v290_v28  ;;  %v413_v31 = vpop.f32.mrb[5].mxu1 }
 0x302   :  { %v332_v32 = vpop.f32.mrb[6].mxu1 }
 0x303   :  { %v335_v33 = vpack.c.bf16 %v330_v30, %v330_v30  ;;  %v414_v34 = vpop.f32.mrb[7].mxu1 }
 0x305   :  { %441 = vtanh.bf16 %v335_v33 }
 0x310   :  { %v442_v35 = vpop.eup %441 }
 0x311   :  { %v337_v36 = vunpack.c.l.bf16 %v442_v35 }
 0x313   :  { %338 = vst [vmem:[#allocation2] sm:$0xff] %v337_v36 }
 0x314   :  { %454 = shalt.err (!%p451_p4)
}
 0x315   :  { %s455_s12 = scalar_lea.hbm %s641_s7, 128 }
 0x316   :  { %p456_p5 = scmp.ne.s32.totalorder %s641_s7, %s455_s12  ;;  %p459_p6 = scmp.lt.u32.totalorder %s455_s12, %s641_s7 }
 0x318   :  { %p461_p7 = pnand %p459_p6, %p456_p5 }
 0x31a   :  { %464 = shalt.err (!%p461_p7)
}
 0x31b   :  { %348 = dma.vmem_to_hbm [thread:$0]  %s346_s9, 128, %s641_s7, [#allocation3]  }
 0x31c   :  { %465 = dma.done.wait [#allocation3], 128  }
 0x31d   :  { %466 = vsyncadd [#allocation3], 4294967168 }
 0x31e   :  { %352 = vsyncpa [#allocation3], 1 }

</bundles_post_ra>
